<compile_context>
chip_gen: v7x
topology: tpu7x:2x2x1
jax: 0.10.0
libtpu: 0.0.40
codegen_flags: <defaults>
</compile_context>

<pallas_src>
import jax
import jax.numpy as jnp
from jax.experimental import pallas as pl
from jax.experimental.pallas import tpu as pltpu


def _transition_kernel(x_ref, scale_ref, shift_ref, w_ref, o_ref):
    # x_ref:     (P, 2, W, Cin)  native input dtype (bf16/f32) -- P row-pairs
    # scale_ref: (1, Cin) f32    gamma / sqrt(var + eps)
    # shift_ref: (1, Cin) f32    beta - mean * scale
    # w_ref:     (Cin, Cout_p)   matmul dtype; 0.5 pooling factor pre-folded, Cout padded to 128
    # o_ref:     (P, W, Cout_p)  output dtype
    x = x_ref[...].astype(jnp.float32)           # upcast in-kernel (bf16 DMA, f32 VPU math)
    s = scale_ref[0]                             # (Cin,)
    b = shift_ref[0]                             # (Cin,)

    # BN (folded, inference) + ReLU in f32 on the VPU.
    y = jnp.maximum(x * s + b, 0.0)              # (P, 2, W, Cin)

    # Row-pair sum BEFORE the 1x1 conv (exact: pool and conv are both linear;
    # the 0.5 average factor lives in the weight).
    ya = y[:, 0] + y[:, 1]                       # (P, W, Cin) -- pure VPU adds

    p, w, cin = ya.shape
    a = ya.reshape(p * w, cin).astype(w_ref.dtype)
    z = jnp.dot(a, w_ref[...], preferred_element_type=jnp.float32)   # (P*W, Cout_p)
    o_ref[...] = z.reshape(p, w, w_ref.shape[1]).astype(o_ref.dtype)


def _vmem_limit_bytes():
    """Generation-aware scoped-VMEM limit (3/4 of physical, capped at 96 MiB)."""
    try:
        cap = getattr(pltpu.get_tpu_info(), "vmem_capacity_bytes", None)
    except Exception:
        cap = None
    if not cap:
        cap = 64 * 1024 * 1024          # conservative (v7x-sized) fallback
    return int(min(cap * 3 // 4, 96 * 1024 * 1024))


def _pick_pairs(total_pairs, W, Cin, Cp, x_itemsize, out_itemsize, w_itemsize, vmem_limit):
    """Largest row-pair tile P whose double-buffered footprint fits the VMEM budget."""
    in_pair = 2 * W * Cin * x_itemsize                 # pipelined input tile, per pair
    out_pair = W * Cp * out_itemsize                   # pipelined output tile, per pair
    tmp_pair = (2 * W * Cin + W * Cin + W * Cp) * 4    # in-kernel f32 BN tile + pooled + acc
    weight = Cin * Cp * w_itemsize
    budget = int(vmem_limit * 0.8) - 2 * weight
    per_pair = 2 * (in_pair + out_pair) + tmp_pair
    p = max(1, budget // per_pair)
    p = min(p, total_pairs)
    if total_pairs >= 2:
        # Keep >= 2 grid steps: enables pipelining and keeps both v7x TensorCores busy.
        p = min(p, pl.cdiv(total_pairs, 2))
    return int(p)


def transition_forward_nhwc(x_nhwc, gamma, beta, running_mean, running_var, conv_w,
                            eps=1e-5, matmul_dtype=jnp.bfloat16, out_dtype=None):
    """NHWC-native entry point (preferred: no layout transposes).
    x_nhwc: (N, H, W, Cin); conv_w: (Cout, Cin).  Returns (N, H//2, W, Cout)."""
    N, H, W, Cin = x_nhwc.shape
    Cout = conv_w.shape[0]
    assert H % 2 == 0  # TODO(synk): adaptive_avg_pool2d with odd H uses uneven bins; assumed even here.
    h_half = H // 2
    if out_dtype is None:
        out_dtype = x_nhwc.dtype

    # Fold BN into per-channel scale/shift (f32).
    scale = gamma.astype(jnp.float32) * jax.lax.rsqrt(running_var.astype(jnp.float32) + eps)
    shift = beta.astype(jnp.float32) - running_mean.astype(jnp.float32) * scale
    scale2 = scale.reshape(1, Cin)
    shift2 = shift.reshape(1, Cin)

    # Lane-dense output: pad Cout up to a multiple of 128 (zeros in the weight),
    # and fold the 0.5 pooling factor into the weight (exact power-of-two scale).
    Cp = -(-Cout // 128) * 128
    w_t = (conv_w.astype(jnp.float32).T * 0.5).astype(matmul_dtype)   # (Cin, Cout)
    if Cp != Cout:
        w_t = jnp.pad(w_t, ((0, 0), (0, Cp - Cout)))

    # Flatten (N, h_half) row-pairs into one leading axis: coarsens over batch and rows
    # simultaneously (row-major reshape: pure view, no HBM pass).
    total_pairs = N * h_half
    x_pairs = x_nhwc.reshape(total_pairs, 2, W, Cin)

    vmem_limit = _vmem_limit_bytes()
    P = _pick_pairs(total_pairs, W, Cin, Cp,
                    jnp.dtype(x_nhwc.dtype).itemsize,
                    jnp.dtype(out_dtype).itemsize,
                    jnp.dtype(matmul_dtype).itemsize,
                    vmem_limit)
    grid = (pl.cdiv(total_pairs, P),)   # ragged last block: OOB output rows are masked

    out = pl.pallas_call(
        _transition_kernel,
        out_shape=jax.ShapeDtypeStruct((total_pairs, W, Cp), out_dtype),
        grid_spec=pltpu.PrefetchScalarGridSpec(
            num_scalar_prefetch=0,
            grid=grid,
            in_specs=[
                pl.BlockSpec((P, 2, W, Cin), lambda i: (i, 0, 0, 0)),
                pl.BlockSpec((1, Cin), lambda i: (0, 0)),
                pl.BlockSpec((1, Cin), lambda i: (0, 0)),
                pl.BlockSpec((Cin, Cp), lambda i: (0, 0)),
            ],
            out_specs=pl.BlockSpec((P, W, Cp), lambda i: (i, 0, 0)),
        ),
        compiler_params=pltpu.CompilerParams(
            dimension_semantics=("parallel",),
            vmem_limit_bytes=vmem_limit,
        ),
    )(x_pairs, scale2, shift2, w_t)

    if Cp != Cout:
        # Parity-only slice; real pipelines should keep the padded lane-dense layout.
        out = out[..., :Cout]
    return out.reshape(N, h_half, W, Cout)


def transition_forward(x_nchw, gamma, beta, running_mean, running_var, conv_w,
                       eps=1e-5, matmul_dtype=jnp.bfloat16, out_dtype=None):
    """NCHW compatibility wrapper matching the PyTorch module (eval mode).
    x_nchw: (N, Cin, H, W) -> (N, Cout, H//2, W).  The transposes are extra HBM
    passes; production code should use transition_forward_nhwc directly."""
    x_nhwc = jnp.transpose(x_nchw, (0, 2, 3, 1))
    out_nhwc = transition_forward_nhwc(x_nhwc, gamma, beta, running_mean, running_var,
                                       conv_w, eps=eps, matmul_dtype=matmul_dtype,
                                       out_dtype=out_dtype)
    return jnp.transpose(out_nhwc, (0, 3, 1, 2))


def _reference(x_nchw, gamma, beta, running_mean, running_var, conv_w, eps=1e-5):
    # Pure-JAX reference mirroring the PyTorch forward (eval-mode BN).
    xb = (x_nchw - running_mean[None, :, None, None]) / jnp.sqrt(
        running_var[None, :, None, None] + eps
    )
    xb = xb * gamma[None, :, None, None] + beta[None, :, None, None]
    xr = jnp.maximum(xb, 0.0)
    out = jnp.einsum("nchw,oc->nohw", xr, conv_w)           # 1x1 conv, no bias
    N, Co, H, W = out.shape
    out = out.reshape(N, Co, H // 2, 2, W).mean(axis=3)
    return out


if __name__ == "__main__":
    key = jax.random.PRNGKey(0)
    N, Cin, H, W = 2, 4, 16, 16
    Cout = 8

    k1, k2, k3, k4, k5, k6 = jax.random.split(key, 6)
    x = jax.random.normal(k1, (N, Cin, H, W), dtype=jnp.float32)
    gamma = 1.0 + 0.1 * jax.random.normal(k2, (Cin,), dtype=jnp.float32)
    beta = 0.1 * jax.random.normal(k3, (Cin,), dtype=jnp.float32)
    running_mean = 0.1 * jax.random.normal(k4, (Cin,), dtype=jnp.float32)
    running_var = jnp.abs(1.0 + 0.1 * jax.random.normal(k5, (Cin,), dtype=jnp.float32))
    conv_w = jax.random.normal(k6, (Cout, Cin), dtype=jnp.float32) * (1.0 / jnp.sqrt(Cin))

    ref = _reference(x, gamma, beta, running_mean, running_var, conv_w)

    # Default path: bf16 MXU matmul, f32 accumulation, f32 in/out (follows input dtype).
    out_def = transition_forward(x, gamma, beta, running_mean, running_var, conv_w)
    jax.block_until_ready(out_def)
    assert out_def.shape == (N, Cout, H // 2, W), out_def.shape
    assert jnp.allclose(out_def, ref, atol=5e-2, rtol=5e-2), float(
        jnp.max(jnp.abs(out_def - ref))
    )

    # f32 matmul path: bit-tight check of the restructured (pool-before-conv, 0.5-in-weight) math.
    out_f32 = transition_forward(x, gamma, beta, running_mean, running_var, conv_w,
                                 matmul_dtype=jnp.float32)
    jax.block_until_ready(out_f32)
    assert jnp.allclose(out_f32, ref, atol=1e-4, rtol=1e-4), float(
        jnp.max(jnp.abs(out_f32 - ref))
    )

    # Production configuration: bf16 activations in (native-dtype DMA), bf16 out.
    x_bf16 = x.astype(jnp.bfloat16)
    ref_bf = _reference(x_bf16.astype(jnp.float32), gamma, beta, running_mean,
                        running_var, conv_w)
    out_bf = transition_forward(x_bf16, gamma, beta, running_mean, running_var, conv_w,
                                out_dtype=jnp.bfloat16)
    jax.block_until_ready(out_bf)
    assert out_bf.dtype == jnp.bfloat16
    assert jnp.allclose(out_bf.astype(jnp.float32), ref_bf, atol=1e-1, rtol=1e-1), float(
        jnp.max(jnp.abs(out_bf.astype(jnp.float32) - ref_bf))
    )

    # Ragged-grid check: total row-pairs (1 * 7) not a multiple of the chosen tile.
    Nr, Hr = 1, 14
    xr = jax.random.normal(jax.random.PRNGKey(1), (Nr, Cin, Hr, W), dtype=jnp.float32)
    ref_r = _reference(xr, gamma, beta, running_mean, running_var, conv_w)
    out_r = transition_forward(xr, gamma, beta, running_mean, running_var, conv_w,
                               matmul_dtype=jnp.float32)
    jax.block_until_ready(out_r)
    assert out_r.shape == (Nr, Cout, Hr // 2, W), out_r.shape
    assert jnp.allclose(out_r, ref_r, atol=1e-4, rtol=1e-4), float(
        jnp.max(jnp.abs(out_r - ref_r))
    )

    print("KERNEL_OK")
</pallas_src>

<mosaic_0001>
module attributes {stable_mosaic.version = 11 : i64} {
  func.func @_transition_kernel(%arg0: i32, %arg1: memref<8x2x16x4xf32, #tpu.memory_space<vmem>>, %arg2: memref<1x4xf32, #tpu.memory_space<vmem>>, %arg3: memref<1x4xf32, #tpu.memory_space<vmem>>, %arg4: memref<4x128xbf16, #tpu.memory_space<vmem>>, %arg5: memref<8x16x128xf32, #tpu.memory_space<vmem>>) attributes {dimension_semantics = [#tpu.dimension_semantics<parallel>], iteration_bounds = array<i64: 2>, scalar_prefetch = 0 : i64, scratch_operands = 0 : i64, tpu.core_type = #tpu.core_type<tc>, window_params = [{transform_indices = @transform_0, window_bounds = array<i64: 8, 2, 16, 4>}, {pipeline_mode = #tpu.pipeline_mode<synchronous>, transform_indices = @transform_1, window_bounds = array<i64: 1, 4>}, {pipeline_mode = #tpu.pipeline_mode<synchronous>, transform_indices = @transform_2, window_bounds = array<i64: 1, 4>}, {pipeline_mode = #tpu.pipeline_mode<synchronous>, transform_indices = @transform_3, window_bounds = array<i64: 4, 128>}, {transform_indices = @transform_4, window_bounds = array<i64: 8, 16, 128>}]} {
    %c0 = arith.constant 0 : index
    %c0_0 = arith.constant 0 : index
    %c0_1 = arith.constant 0 : index
    %c0_2 = arith.constant 0 : index
    %0 = vector.load %arg1[%c0, %c0_0, %c0_1, %c0_2] : memref<8x2x16x4xf32, #tpu.memory_space<vmem>>, vector<8x2x16x4xf32>
    %c0_3 = arith.constant 0 : index
    %c0_4 = arith.constant 0 : index
    %1 = vector.load %arg2[%c0_3, %c0_4] : memref<1x4xf32, #tpu.memory_space<vmem>>, vector<1x4xf32>
    %2 = vector.shape_cast %1 : vector<1x4xf32> to vector<4xf32>
    %c0_5 = arith.constant 0 : index
    %c0_6 = arith.constant 0 : index
    %3 = vector.load %arg3[%c0_5, %c0_6] : memref<1x4xf32, #tpu.memory_space<vmem>>, vector<1x4xf32>
    %4 = vector.shape_cast %3 : vector<1x4xf32> to vector<4xf32>
    %5 = vector.shape_cast %2 : vector<4xf32> to vector<1x1x1x4xf32>
    %6 = vector.broadcast %5 : vector<1x1x1x4xf32> to vector<8x2x16x4xf32>
    %7 = arith.mulf %0, %6 : vector<8x2x16x4xf32>
    %8 = vector.shape_cast %4 : vector<4xf32> to vector<1x1x1x4xf32>
    %9 = vector.broadcast %8 : vector<1x1x1x4xf32> to vector<8x2x16x4xf32>
    %10 = arith.addf %7, %9 : vector<8x2x16x4xf32>
    %cst = arith.constant 0.000000e+00 : f32
    %11 = vector.broadcast %cst : f32 to vector<8x2x16x4xf32>
    %12 = arith.maximumf %10, %11 : vector<8x2x16x4xf32>
    %13 = vector.extract_strided_slice %12 {offsets = [0, 0, 0, 0], sizes = [8, 1, 16, 4], strides = [1, 1, 1, 1]} : vector<8x2x16x4xf32> to vector<8x1x16x4xf32>
    %14 = vector.shape_cast %13 : vector<8x1x16x4xf32> to vector<8x16x4xf32>
    %15 = vector.extract_strided_slice %12 {offsets = [0, 1, 0, 0], sizes = [8, 1, 16, 4], strides = [1, 1, 1, 1]} : vector<8x2x16x4xf32> to vector<8x1x16x4xf32>
    %16 = vector.shape_cast %15 : vector<8x1x16x4xf32> to vector<8x16x4xf32>
    %17 = arith.addf %14, %16 : vector<8x16x4xf32>
    %18 = vector.shape_cast %17 : vector<8x16x4xf32> to vector<128x4xf32>
    %19 = arith.truncf %18 : vector<128x4xf32> to vector<128x4xbf16>
    %c0_7 = arith.constant 0 : index
    %c0_8 = arith.constant 0 : index
    %20 = vector.load %arg4[%c0_7, %c0_8] : memref<4x128xbf16, #tpu.memory_space<vmem>>, vector<4x128xbf16>
    %cst_9 = arith.constant dense<0.000000e+00> : vector<128x128xf32>
    %21 = tpu.matmul %19, %20, %cst_9 {dimension_numbers = #tpu.dot_dimension_numbers<[1], [0], [0], [1], [0, 0, 1, 1], [], []>} : vector<128x4xbf16>, vector<4x128xbf16>, vector<128x128xf32> -> vector<128x128xf32>
    %22 = vector.shape_cast %21 : vector<128x128xf32> to vector<8x16x128xf32>
    %c0_10 = arith.constant 0 : index
    %c0_11 = arith.constant 0 : index
    %c0_12 = arith.constant 0 : index
    %23 = vector.load %arg5[%c0_10, %c0_11, %c0_12] : memref<8x16x128xf32, #tpu.memory_space<vmem>>, vector<8x16x128xf32>
    tpu.vector_store %arg5[%c0_10, %c0_11, %c0_12], %22 {strides = array<i32>} : memref<8x16x128xf32, #tpu.memory_space<vmem>>, vector<8x16x128xf32>,
    return
  }
  func.func @transform_0(%arg0: i32) -> (i32, i32, i32, i32) {
    %c0_i32 = arith.constant 0 : i32
    %c0_i32_0 = arith.constant 0 : i32
    %c0_i32_1 = arith.constant 0 : i32
    %c0_i32_2 = arith.constant 0 : i32
    return %arg0, %c0_i32, %c0_i32_0, %c0_i32_1 : i32, i32, i32, i32
  }
  func.func @transform_1(%arg0: i32) -> (i32, i32) {
    %c0_i32 = arith.constant 0 : i32
    %c0_i32_0 = arith.constant 0 : i32
    %c0_i32_1 = arith.constant 0 : i32
    return %c0_i32, %c0_i32_0 : i32, i32
  }
  func.func @transform_2(%arg0: i32) -> (i32, i32) {
    %c0_i32 = arith.constant 0 : i32
    %c0_i32_0 = arith.constant 0 : i32
    %c0_i32_1 = arith.constant 0 : i32
    return %c0_i32, %c0_i32_0 : i32, i32
  }
  func.func @transform_3(%arg0: i32) -> (i32, i32) {
    %c0_i32 = arith.constant 0 : i32
    %c0_i32_0 = arith.constant 0 : i32
    %c0_i32_1 = arith.constant 0 : i32
    return %c0_i32, %c0_i32_0 : i32, i32
  }
  func.func @transform_4(%arg0: i32) -> (i32, i32, i32) {
    %c0_i32 = arith.constant 0 : i32
    %c0_i32_0 = arith.constant 0 : i32
    %c0_i32_1 = arith.constant 0 : i32
    return %arg0, %c0_i32, %c0_i32_0 : i32, i32, i32
  }
}

</mosaic_0001>

<bundles_post_ra>
// kernel: tpu_custom_call.1
= control target key start
LH: loop header
LB: loop body
LE: loop exit
PB: predicated region body
PF: predicated region fallthrough
CT: control target
= control target key end

     0   :  { %9 = vsyncpa [#allocation3], 0  ;;  %s1024_s0 = inlined_call_operand.vmem [shape: f32[16,2,16,4], index: 0, kind: input, shape index: {}]   ;;  %s1025_s1 = inlined_call_operand.vmem [shape: f32[1,4], index: 1, kind: input, shape index: {}]   ;;  %s1026_s2 = inlined_call_operand.vmem [shape: f32[1,4], index: 2, kind: input, shape index: {}]   ;;  %s1027_s3 = inlined_call_operand.vmem [shape: bf16[4,128], index: 3, kind: input, shape index: {}]   ;;  %s1028_s4 = inlined_call_operand.hbm [shape: f32[16,16,128], index: 4, kind: output, shape index: {}]  }
   0x1   :  { %11 = vsyncpa [#allocation3 + $0x1], 0  ;;  %s780_s15 = smov 0   ;;  %s782_s16 = smov 0  }
   0x2   :  { %s784_s17 = smov 0   ;;  %s786_s18 = smov 0  }
   0x3 LB: > { %s801_s19 = sadd.s32 4294967295, %s750_s18   ;;  %s589_s20 = sadd.s32 4294967294, %s750_s18   ;;  %s750_s18 = sphi %s786_s18, %s1034_s18   ;;  %s746_s17 = sphi %s784_s17, %s1033_s17   ;;  %s742_s16 = sphi %s782_s16, %s1032_s16   ;;  %s738_s15 = sphi %s780_s15, %s1031_s15  }
   0x4   : > { %s805_s21 = sadd.s32 1, %s750_s18   ;;  %s113_s22 = sadd.s32 1, %s746_s17 }
   0x5   : > { %s110_s23 = ssub.s32 %s750_s18, %s805_s21  ;;  %p123_p0 = scmp.ne.s32.totalorder %s746_s17, %s742_s16 }
   0x6   : > { %p111_p1 = scmp.eq.s32.totalorder %s110_s23, 0  ;;  %p124_p2 = scmp.eq.s32.totalorder %s801_s19, 1 }
   0x7   : > { %p129_p3 = scmp.ne.s32.totalorder %s742_s16, %s738_s15  ;;  %p130_p4 = scmp.eq.s32.totalorder %s589_s20, 1 }
   0x8   : > { %s816_s24 = scalar_select %p111_p1, %s746_s17, %s113_s22  }
   0x9   : > { %p818_p5 = por %p124_p2, %p123_p0  ;;  %p822_p6 = por %p130_p4, %p129_p3 }
   0xa   : > { %p592_p7 = scmp.ge.s32.totalorder %s750_s18, 1  ;;  %p167_p8 = scmp.lt.s32.totalorder %s750_s18, 3 }
   0xc   : > { %p168_p9 = pnand %p592_p7, %p167_p8 }
   0xd   : > { %v369_v0 = vld [vmem:[%s1027_s3] sm:$0x3] (!%p168_p9)  ;;  %vm395_vm0 = vcmask (!%p168_p9), 1041408   ;;  %s594_s29 = sshll.u32 (!%p168_p9), %s801_s19, 3  ;;  %vm370_vm1 = vcmask (!%p168_p9), 31744   ;;  %s191_s12 = sand.u32 (!%p168_p9), 1, %s742_s16  }
   0xe   : > { %171 = sbr.rel (%p168_p9) target bundleno = 291 (0x123), region = 36  ;;  %645 = vmatprep.subr.msk.bf16.mxu0 (!%p168_p9), %vm395_vm0, %v369_v0  ;;  %646 = vmatprep.subr.msk.bf16.mxu1 (!%p168_p9), %vm395_vm0, %v369_v0  ;;  %v397_v1 = vsel (!%p168_p9), %vm395_vm0, %v369_v0, 0  ;;  %p195_p10 = scmp.lt.s32.totalorder (!%p168_p9), %s594_s29, 15  ;;  %v835_v2 = vld [vmem:[%s1025_s1] ss:$0 sm:$0xff] (!%p168_p9) }
   0xf   : > { %626 = vmatpush3.bf16.msra.mxu0 (!%p168_p9), %v397_v1  ;;  %644 = vmatpush3.bf16.msra.mxu1 (!%p168_p9), %v397_v1  ;;  %v845_v3 = vld [vmem:[%s1026_s2] ss:$0 sm:$0xff] (!%p168_p9)  ;;  %s593_s13 = sshll.u32 (!%p168_p9), %s191_s12, 7  ;;  %s615_s20 = sshll.u32 (!%p168_p9), %s801_s19, 11 }
  0x10   : > { %s954_s14 = scalar_lea.vmem (!%p168_p9), [#allocation2], %s593_s13  ;;  %s974_s28 = scalar_lea.hbm (!%p168_p9), %s1028_s4, %s615_s20 }
  0x11   : > { %s527_s22 = sshll.u32 (!%p168_p9), %s954_s14, 4  ;;  %s983_s19 = scalar_lea.sflag (!%p168_p9), [#allocation3], %s191_s12  ;;  %s976_s22 = int_to_ptr.vmem [resolvable:$true] %s527_s22 }
  0x15   : > { %s1036_s29 = smov (!%p195_p10, %s594_s29), 15 }
  0x16   : > { %s613_s30 = sshll.u32 %s1036_s29, 5  ;;  %s688_s29 = scalar_lea.vmem %s976_s22, 2048 }
  0x17   : > { %s840_s9 = scalar_lea.vmem %s1024_s0, %s613_s30  ;;  %p689_p11 = scmp.ne.s32.totalorder %s976_s22, %s688_s29 }
  0x18   : > { %v203_v4 = vld [vmem:[%s840_s9] sm:$0xff]  ;;  %v204_v5 = vld [vmem:[%s840_s9 + $0x8] sm:$0xff]  ;;  %v205_v6 = vld [vmem:[%s840_s9 + $0x10] sm:$0xff]  ;;  %s752_s30 = smov [#allocation2]  }
  0x19   : > { %v206_v7 = vld [vmem:[%s840_s9 + $0x18] sm:$0xff]  ;;  %v243_v8 = vmul.f32 %v835_v2, %v203_v4  ;;  %v244_v9 = vmul.f32 %v835_v2, %v204_v5  ;;  %v245_v10 = vmul.f32 %v835_v2, %v205_v6  ;;  %v219_v11 = vld [vmem:[%s840_s9 + $0x80] sm:$0xff]  ;;  %v220_v12 = vld [vmem:[%s840_s9 + $0x88] sm:$0xff]  ;;  %p690_p12 = pnand %p689_p11, %p818_p5  ;;  %s692_s5 = sshll.u32 %s752_s30, 4  ;;  %s693_s5 = int_to_ptr.vmem [resolvable:$false] %s692_s5 }
  0x1a   : > { %v246_v13 = vmul.f32 %v835_v2, %v206_v7  ;;  %v221_v14 = vld [vmem:[%s840_s9 + $0x90] sm:$0xff]  ;;  %v222_v15 = vld [vmem:[%s840_s9 + $0x98] sm:$0xff]  ;;  %v259_v16 = vmul.f32 %v835_v2, %v219_v11  ;;  %v260_v17 = vmul.f32 %v835_v2, %v220_v12  ;;  %v207_v26 = vld [vmem:[%s840_s9 + $0x20] sm:$0xff]  ;;  %s694_s6 = scalar_lea.vmem %s693_s5, 4096  ;;  %p695_p0 = scmp.lt.s32.totalorder %s976_s22, %s693_s5 }
  0x1b   : > { %v281_v18 = vadd.f32 %v845_v3, %v243_v8  ;;  %v282_v19 = vadd.f32 %v845_v3, %v244_v9  ;;  %v283_v20 = vadd.f32 %v845_v3, %v245_v10  ;;  %v261_v21 = vmul.f32 %v835_v2, %v221_v14  ;;  %v208_v27 = vld [vmem:[%s840_s9 + $0x28] sm:$0xff]  ;;  %v209_v32 = vld [vmem:[%s840_s9 + $0x30] sm:$0xff]  ;;  %v210_v33 = vld [vmem:[%s840_s9 + $0x38] sm:$0xff]  ;;  %p691_p13 = pneg %p690_p12  ;;  %p696_p1 = scmp.lt.s32.totalorder %s694_s6, %s688_s29 }
  0x1c   : > { %v284_v22 = vadd.f32 %v845_v3, %v246_v13  ;;  %v262_v23 = vmul.f32 %v835_v2, %v222_v15  ;;  %v297_v24 = vadd.f32 %v845_v3, %v259_v16  ;;  %v298_v25 = vadd.f32 %v845_v3, %v260_v17  ;;  %v223_v38 = vld [vmem:[%s840_s9 + $0xa0] sm:$0xff]  ;;  %v224_v47 = vld [vmem:[%s840_s9 + $0xa8] sm:$0xff]  ;;  %v225_v48 = vld [vmem:[%s840_s9 + $0xb0] sm:$0xff] }
  0x1d   : > { %v313_v28 = vmax.f32 %v281_v18, 0.0  ;;  %v314_v29 = vmax.f32 %v282_v19, 0.0  ;;  %v315_v30 = vmax.f32 %v283_v20, 0.0  ;;  %v299_v31 = vadd.f32 %v845_v3, %v261_v21  ;;  %v226_v52 = vld [vmem:[%s840_s9 + $0xb8] sm:$0xff]  ;;  %v211_v58 = vld [vmem:[%s840_s9 + $0x40] sm:$0xff]  ;;  %v212_v63 = vld [vmem:[%s840_s9 + $0x48] sm:$0xff]  ;;  %p697_p2 = por %p696_p1, %p695_p0 }
  0x1e   : > { %v316_v34 = vmax.f32 %v284_v22, 0.0  ;;  %v300_v35 = vadd.f32 %v845_v3, %v262_v23  ;;  %v329_v36 = vmax.f32 %v297_v24, 0.0  ;;  %v330_v37 = vmax.f32 %v298_v25, 0.0  ;;  %v213_v6 = vld [vmem:[%s840_s9 + $0x50] sm:$0xff]  ;;  %v214_v10 = vld [vmem:[%s840_s9 + $0x58] sm:$0xff]  ;;  %v227_v16 = vld [vmem:[%s840_s9 + $0xc0] sm:$0xff] }
  0x1f   : > { %v345_v39 = vadd.f32 %v315_v30, %v313_v28  ;;  %v331_v40 = vmax.f32 %v299_v31, 0.0  ;;  %v247_v41 = vmul.f32 %v835_v2, %v207_v26  ;;  %v248_v42 = vmul.f32 %v835_v2, %v208_v27  ;;  %v228_v21 = vld [vmem:[%s840_s9 + $0xc8] sm:$0xff]  ;;  %v229_v26 = vld [vmem:[%s840_s9 + $0xd0] sm:$0xff]  ;;  %v230_v27 = vld [vmem:[%s840_s9 + $0xd8] sm:$0xff]  ;;  %p698_p3 = pnand %p697_p2, %p691_p13 }
  0x20   : > { %v346_v43 = vadd.f32 %v316_v34, %v314_v29  ;;  %v332_v44 = vmax.f32 %v300_v35, 0.0  ;;  %v249_v45 = vmul.f32 %v835_v2, %v209_v32  ;;  %v250_v46 = vmul.f32 %v835_v2, %v210_v33 }
  0x21   : > { %v353_v49 = vadd.f32 %v331_v40, %v329_v36  ;;  %v285_v50 = vadd.f32 %v845_v3, %v247_v41  ;;  %v286_v51 = vadd.f32 %v845_v3, %v248_v42  ;;  %v263_v53 = vmul.f32 %v835_v2, %v223_v38  ;;  %v215_v36 = vld [vmem:[%s840_s9 + $0x60] sm:$0xff]  ;;  %v216_v41 = vld [vmem:[%s840_s9 + $0x68] sm:$0xff] }
  0x22   : > { %v361_v54 = vpack.c.bf16 %v346_v43, %v345_v39  ;;  %v354_v55 = vadd.f32 %v332_v44, %v330_v37  ;;  %v287_v56 = vadd.f32 %v845_v3, %v249_v45  ;;  %v288_v57 = vadd.f32 %v845_v3, %v250_v46  ;;  %v217_v46 = vld [vmem:[%s840_s9 + $0x70] sm:$0xff] }
  0x23   : > { %v317_v59 = vmax.f32 %v285_v50, 0.0  ;;  %v318_v60 = vmax.f32 %v286_v51, 0.0  ;;  %v264_v61 = vmul.f32 %v835_v2, %v224_v47  ;;  %v265_v62 = vmul.f32 %v835_v2, %v225_v48  ;;  %v218_v47 = vld [vmem:[%s840_s9 + $0x78] sm:$0xff] }
  0x24   : > { %627 = vmatprep.mubr.msk.bf16.mxu0 %vm370_vm1, %v361_v54  ;;  %v365_v0 = vpack.c.bf16 %v354_v55, %v353_v49  ;;  %v319_v1 = vmax.f32 %v287_v56, 0.0  ;;  %v320_v4 = vmax.f32 %v288_v57, 0.0  ;;  %v266_v5 = vmul.f32 %v835_v2, %v226_v52  ;;  %v231_v52 = vld [vmem:[%s840_s9 + $0xe0] sm:$0xff] }
  0x25   : > { %v301_v7 = vadd.f32 %v845_v3, %v263_v53  ;;  %v302_v8 = vadd.f32 %v845_v3, %v264_v61  ;;  %v303_v9 = vadd.f32 %v845_v3, %v265_v62  ;;  %v251_v11 = vmul.f32 %v835_v2, %v211_v58  ;;  %v232_v61 = vld [vmem:[%s840_s9 + $0xe8] sm:$0xff]  ;;  %v233_v62 = vld [vmem:[%s840_s9 + $0xf0] sm:$0xff] }
  0x26   : > { %635 = vmatprep.mubr.msk.bf16.mxu1 %vm370_vm1, %v365_v0  ;;  %v347_v12 = vadd.f32 %v319_v1, %v317_v59  ;;  %v348_v13 = vadd.f32 %v320_v4, %v318_v60  ;;  %v304_v14 = vadd.f32 %v845_v3, %v266_v5  ;;  %v252_v15 = vmul.f32 %v835_v2, %v212_v63  ;;  %v234_v4 = vld [vmem:[%s840_s9 + $0xf8] sm:$0xff] }
  0x27   : > { %v333_v17 = vmax.f32 %v301_v7, 0.0  ;;  %v334_v18 = vmax.f32 %v302_v8, 0.0  ;;  %v335_v19 = vmax.f32 %v303_v9, 0.0  ;;  %v253_v20 = vmul.f32 %v835_v2, %v213_v6 }
  0x28   : > { %v362_v22 = vpack.c.bf16 %v348_v13, %v347_v12  ;;  %v336_v23 = vmax.f32 %v304_v14, 0.0  ;;  %v254_v24 = vmul.f32 %v835_v2, %v214_v10  ;;  %v289_v25 = vadd.f32 %v845_v3, %v251_v11 }
  0x29   : > { %v355_v28 = vadd.f32 %v335_v19, %v333_v17  ;;  %v290_v29 = vadd.f32 %v845_v3, %v252_v15  ;;  %v291_v30 = vadd.f32 %v845_v3, %v253_v20  ;;  %v267_v31 = vmul.f32 %v835_v2, %v227_v16 }
  0x2a   : > { %628 = vmatmul.mubr.msk.bf16.vlgmr.msra.gmra.mrb[0].mxu0 %vm370_vm1, %v362_v22  ;;  %v356_v32 = vadd.f32 %v336_v23, %v334_v18  ;;  %v292_v33 = vadd.f32 %v845_v3, %v254_v24  ;;  %v321_v34 = vmax.f32 %v289_v25, 0.0  ;;  %v268_v35 = vmul.f32 %v835_v2, %v228_v21 }
  0x2b   : > { %v322_v37 = vmax.f32 %v290_v29, 0.0  ;;  %v323_v38 = vmax.f32 %v291_v30, 0.0  ;;  %v269_v39 = vmul.f32 %v835_v2, %v229_v26  ;;  %v270_v40 = vmul.f32 %v835_v2, %v230_v27 }
  0x2c   : > { %v366_v42 = vpack.c.bf16 %v356_v32, %v355_v28  ;;  %v324_v43 = vmax.f32 %v292_v33, 0.0  ;;  %v305_v44 = vadd.f32 %v845_v3, %v267_v31  ;;  %v306_v45 = vadd.f32 %v845_v3, %v268_v35 }
  0x2d   : > { %v349_v48 = vadd.f32 %v323_v38, %v321_v34  ;;  %v307_v49 = vadd.f32 %v845_v3, %v269_v39  ;;  %v308_v50 = vadd.f32 %v845_v3, %v270_v40  ;;  %v255_v51 = vmul.f32 %v835_v2, %v215_v36 }
  0x2e   : > { %636 = vmatmul.mubr.msk.bf16.vlgmr.msra.gmra.mrb[0].mxu1 %vm370_vm1, %v366_v42  ;;  %v350_v53 = vadd.f32 %v324_v43, %v322_v37  ;;  %v337_v54 = vmax.f32 %v305_v44, 0.0  ;;  %v338_v55 = vmax.f32 %v306_v45, 0.0  ;;  %v256_v56 = vmul.f32 %v835_v2, %v216_v41 }
  0x2f   : > { %v339_v57 = vmax.f32 %v307_v49, 0.0  ;;  %v340_v58 = vmax.f32 %v308_v50, 0.0  ;;  %v257_v59 = vmul.f32 %v835_v2, %v217_v46  ;;  %v258_v60 = vmul.f32 %v835_v2, %v218_v47 }
  0x30   : > { %v363_v63 = vpack.c.bf16 %v350_v53, %v349_v48  ;;  %v293_v0 = vadd.f32 %v845_v3, %v255_v51  ;;  %v294_v1 = vadd.f32 %v845_v3, %v256_v56  ;;  %v271_v5 = vmul.f32 %v835_v2, %v231_v52 }
  0x31   : > { %v357_v6 = vadd.f32 %v339_v57, %v337_v54  ;;  %v358_v7 = vadd.f32 %v340_v58, %v338_v55  ;;  %v295_v8 = vadd.f32 %v845_v3, %v257_v59  ;;  %v296_v9 = vadd.f32 %v845_v3, %v258_v60 }
  0x32   : > { %631 = vmatprep.mubr.msk.bf16.mxu0 %vm370_vm1, %v363_v63  ;;  %v325_v10 = vmax.f32 %v293_v0, 0.0  ;;  %v326_v11 = vmax.f32 %v294_v1, 0.0  ;;  %v272_v12 = vmul.f32 %v835_v2, %v232_v61  ;;  %v273_v13 = vmul.f32 %v835_v2, %v233_v62 }
  0x33   : > { %v367_v14 = vpack.c.bf16 %v358_v7, %v357_v6  ;;  %v327_v15 = vmax.f32 %v295_v8, 0.0  ;;  %v328_v16 = vmax.f32 %v296_v9, 0.0  ;;  %v274_v17 = vmul.f32 %v835_v2, %v234_v4 }
  0x34   : > { %v309_v18 = vadd.f32 %v845_v3, %v271_v5  ;;  %v310_v19 = vadd.f32 %v845_v3, %v272_v12  ;;  %v311_v20 = vadd.f32 %v845_v3, %v273_v13 }
  0x35   : > { %639 = vmatprep.mubr.msk.bf16.mxu1 %vm370_vm1, %v367_v14  ;;  %v351_v21 = vadd.f32 %v327_v15, %v325_v10  ;;  %v352_v22 = vadd.f32 %v328_v16, %v326_v11  ;;  %v312_v23 = vadd.f32 %v845_v3, %v274_v17 }
  0x36   : > { %v341_v24 = vmax.f32 %v309_v18, 0.0  ;;  %v342_v25 = vmax.f32 %v310_v19, 0.0  ;;  %v343_v26 = vmax.f32 %v311_v20, 0.0 }
  0x37   : > { %v364_v27 = vpack.c.bf16 %v352_v22, %v351_v21  ;;  %v344_v28 = vmax.f32 %v312_v23, 0.0 }
  0x38   : > { %v359_v2 = vadd.f32 %v343_v26, %v341_v24 }
  0x39   : > { %632 = vmatmul.mubr.msk.bf16.gmra.mrb[4].mxu0 %vm370_vm1, %v364_v27  ;;  %v360_v29 = vadd.f32 %v344_v28, %v342_v25 }
  0x3b   : > { %v368_v30 = vpack.c.bf16 %v360_v29, %v359_v2 }
  0x3d   : > { %640 = vmatmul.mubr.msk.bf16.gmra.mrb[4].mxu1 %vm370_vm1, %v368_v30 }
  0xfd   : > { %v629_v31 = vpop.f32.mrb[0].mxu0 }
  0xfe   : > { %498 = vst [vmem:[%s954_s14 + $0x10] sm:$0xff] %v629_v31  ;;  %v433_v3 = vpop.f32.mrb[1].mxu0 }
  0xff   : > { %496 = vst [vmem:[%s954_s14] sm:$0xff] %v433_v3  ;;  %v630_v32 = vpop.f32.mrb[2].mxu0 }
 0x100   : > { %499 = vst [vmem:[%s954_s14 + $0x18] sm:$0xff] %v630_v32  ;;  %v436_v33 = vpop.f32.mrb[3].mxu0 }
 0x101   : > { %v637_v34 = vpop.f32.mrb[0].mxu1  ;;  %497 = vst [vmem:[%s954_s14 + $0x8] sm:$0xff] %v436_v33 }
 0x102   : > { %506 = vst [vmem:[%s954_s14 + $0x50] sm:$0xff] %v637_v34  ;;  %v465_v35 = vpop.f32.mrb[1].mxu1 }
 0x103   : > { %504 = vst [vmem:[%s954_s14 + $0x40] sm:$0xff] %v465_v35  ;;  %v638_v36 = vpop.f32.mrb[2].mxu1 }
 0x104   : > { %507 = vst [vmem:[%s954_s14 + $0x58] sm:$0xff] %v638_v36  ;;  %v468_v37 = vpop.f32.mrb[3].mxu1 }
 0x105   : > { %505 = vst [vmem:[%s954_s14 + $0x48] sm:$0xff] %v468_v37 }
 0x10c   : > { %v633_v38 = vpop.f32.mrb[4].mxu0 }
 0x10d   : > { %502 = vst [vmem:[%s954_s14 + $0x30] sm:$0xff] %v633_v38  ;;  %v449_v39 = vpop.f32.mrb[5].mxu0 }
 0x10e   : > { %500 = vst [vmem:[%s954_s14 + $0x20] sm:$0xff] %v449_v39  ;;  %v634_v40 = vpop.f32.mrb[6].mxu0 }
 0x10f   : > { %503 = vst [vmem:[%s954_s14 + $0x38] sm:$0xff] %v634_v40  ;;  %v452_v41 = vpop.f32.mrb[7].mxu0 }
 0x110   : > { %v641_v42 = vpop.f32.mrb[4].mxu1  ;;  %501 = vst [vmem:[%s954_s14 + $0x28] sm:$0xff] %v452_v41 }
 0x111   : > { %510 = vst [vmem:[%s954_s14 + $0x70] sm:$0xff] %v641_v42  ;;  %v481_v43 = vpop.f32.mrb[5].mxu1 }
 0x112   : > { %508 = vst [vmem:[%s954_s14 + $0x60] sm:$0xff] %v481_v43  ;;  %v642_v44 = vpop.f32.mrb[6].mxu1 }
 0x113   : > { %511 = vst [vmem:[%s954_s14 + $0x78] sm:$0xff] %v642_v44  ;;  %v484_v45 = vpop.f32.mrb[7].mxu1 }
 0x114   : > { %509 = vst [vmem:[%s954_s14 + $0x68] sm:$0xff] %v484_v45 }
 0x115   : > { %701 = shalt.err (!%p698_p3)
}
 0x116   : > { %s702_s7 = scalar_lea.hbm %s974_s28, 2048  ;;  %s706_s10 = scalar_lea.hbm %s1028_s4, 4096 }
 0x117   : > { %p703_p4 = scmp.ne.s32.totalorder %s974_s28, %s702_s7  ;;  %p707_p9 = scmp.lt.u32.totalorder %s974_s28, %s1028_s4 }
 0x118   : > { %p708_p10 = scmp.lt.u32.totalorder %s706_s10, %s702_s7  ;;  %p710_p12 = scmp.lt.u32.totalorder %s702_s7, %s974_s28 }
 0x119   : > { %p704_p7 = pnand %p703_p4, %p818_p5 }
 0x11a   : > { %p709_p11 = por %p708_p10, %p707_p9 }
 0x11b   : > { %p705_p8 = pneg %p704_p7 }
 0x11c   : > { %p711_p13 = por %p710_p12, %p709_p11 }
 0x11e   : > { %p712_p0 = pnand %p711_p13, %p705_p8 }
 0x120   : > { %715 = shalt.err (!%p712_p0)
}
 0x121   : > { %s753_s13 = smov 128   ;;  %s754_s14 = smov 8  }
 0x122   : > { %647 = dma.vmem_to_hbm [thread:$0]  (%p818_p5), %s976_s22, 2048, %s974_s28, %s983_s19, %s753_s13, %s753_s13, %s754_s14  }
 0x123 PF: > { %p653_p1 = scmp.ge.s32.totalorder %s750_s18, 2  ;;  %s542_s20 = sand.u32 1, %s738_s15  }
 0x124   : > { %s543_s23 = scalar_lea.sflag [#allocation3], %s542_s20 }
 0x125   : > { %p650_p2 = pnand %p653_p1, %p822_p6 }
 0x127   : > { %733 = dma.done.wait (!%p650_p2), %s543_s23, 2048  }
 0x128   : > { %735 = vsyncadd (!%p650_p2), %s543_s23, 4294965248  ;;  %p14_p3 = scmp.ge.s32.totalorder %s805_s21, 4   ;;  %s1031_s15 = smov %s742_s16 }
 0x129   : > { %s1032_s16 = smov %s746_s17  ;;  %s1033_s17 = smov %s816_s24 }
 0x12a   : > { %s1034_s18 = smov %s805_s21  ;;  %16 = sbr.rel (!%p14_p3) target bundleno = 3 (0x3), region = 71 }
 0x131   :  { %548 = vsyncpa [#allocation3], 1 }
 0x132   :  { %550 = vsyncpa [#allocation3 + $0x1], 1 }

</bundles_post_ra>
